<compile_context>
chip_gen: v7x
topology: tpu7x:2x2x1
jax: 0.10.0
libtpu: 0.0.40
codegen_flags: <defaults>
</compile_context>

<pallas_src>
import math
import functools

import jax
import jax.numpy as jnp
from jax import lax
from jax.experimental import pallas as pl
from jax.experimental.pallas import tpu as pltpu

LN_EPS = 1e-5  # torch.nn.LayerNorm default


def _gelu_exact(x):
    # torch.nn.GELU default (approximate='none'): exact erf-based GELU.
    return x * 0.5 * (1.0 + lax.erf(x * (1.0 / math.sqrt(2.0))))


def _layernorm(x, gamma, beta):
    mu = jnp.mean(x, axis=-1, keepdims=True)
    var = jnp.mean((x - mu) ** 2, axis=-1, keepdims=True)
    return (x - mu) * lax.rsqrt(var + LN_EPS) * gamma + beta


def _transformer_layer_kernel(
    x_ref, ln1_g, ln1_b, w_qkv, w_prj, b_prj, ln2_g, ln2_b, w1, b1, w2, b2,
    out_ref, attn_ref, q_scr, k_scr, v_scr, *, num_heads, head_size,
):
    H, D = num_heads, head_size

    x = x_ref[0]                              # (N, E)
    N, E = x.shape

    # ---- pn1: LayerNorm --------------------------------------------------
    xn = _layernorm(x, ln1_g[0], ln1_b[0])

    # ---- MHSA (all heads batched on the MXU) -------------------------------
    # qkv_t[c, n] = sum_e w_qkv[c, e] * xn[n, e]; 1/sqrt(D) is pre-folded into the
    # Q rows of w_qkv on the host.  Transposed orientation => per-head splits below
    # are sublane (row) slices rather than narrow lane strips.
    qkv_t = lax.dot_general(
        w_qkv[...], xn, (((1,), (1,)), ((), ())),
        preferred_element_type=jnp.float32)                      # (3*H*D, N)

    # Layout-only relayout into head-major scratch (no matmuls in this loop).
    for h in range(H):                                           # static unroll
        q_scr[h] = qkv_t[h * D:(h + 1) * D, :].T                 # (N, D)
        k_scr[h] = qkv_t[(H + h) * D:(H + h + 1) * D, :]         # (D, N) - no .T
        v_scr[h] = qkv_t[(2 * H + h) * D:(2 * H + h + 1) * D, :].T

    q = q_scr[...]                                               # (H, N, D), pre-scaled
    k_t = k_scr[...]                                             # (H, D, N)
    v = v_scr[...]                                               # (H, N, D)

    # TODO(synk): optional attention mask (forward(mask=...)) not implemented;
    # the module default mask=None path is what this kernel computes.
    scores = jnp.einsum('hnd,hdm->hnm', q, k_t,
                        preferred_element_type=jnp.float32)       # (H, N, N)
    m = jnp.max(scores, axis=-1, keepdims=True)
    e = jnp.exp(scores - m)
    inv = pl.reciprocal(jnp.sum(e, axis=-1, keepdims=True))       # exact; 1 recip/row
    attn = e * inv
    attn_ref[0] = attn                                            # single all-head store

    ctx = jnp.einsum('hnm,hmd->hnd', attn, v,
                     preferred_element_type=jnp.float32)          # (H, N, D)
    # Head-batched projection, then a cheap sum over the (outer) head axis.
    y = jnp.sum(jnp.einsum('hnd,hde->hne', ctx, w_prj[...],
                           preferred_element_type=jnp.float32), axis=0)  # (N, E)

    x1 = x + y + b_prj[0]                  # prj bias; dropout(p=0) is identity

    # ---- pn2 + MLP ---------------------------------------------------------
    xn2 = _layernorm(x1, ln2_g[0], ln2_b[0])
    h1 = jnp.dot(xn2, w1[...], preferred_element_type=jnp.float32) + b1[0]
    h1 = _gelu_exact(h1)
    out_ref[0] = x1 + jnp.dot(h1, w2[...], preferred_element_type=jnp.float32) + b2[0]


def transformer_layer(x, params, *, num_heads, head_size):
    """x: (B, N, E) float32.  params use PyTorch-native layouts (see __main__).
    Returns (output (B, N, E), attn (B, H, N, N))."""
    B, N, E = x.shape
    H, D = num_heads, head_size
    HD = H * D
    I = params["w1"].shape[0]                         # w1 is (I, E) torch layout

    # ---- host-side parameter prep (layout + scale folding) -----------------
    scale = 1.0 / math.sqrt(D)
    w_qkv = params["qkv_w"].at[:HD, :].multiply(scale)     # (3HD, E), Q rows scaled
    w_prj = params["prj_w"].T.reshape(H, D, E)             # (H, D, E)
    b_prj = params["prj_b"].reshape(1, E)
    w1_t = params["w1"].T                                  # (E, I)
    w2_t = params["w2"].T                                  # (I, E)
    b1 = params["b1"].reshape(1, I)
    b2 = params["b2"].reshape(1, E)
    ln1_g = params["ln1_g"].reshape(1, E)
    ln1_b = params["ln1_b"].reshape(1, E)
    ln2_g = params["ln2_g"].reshape(1, E)
    ln2_b = params["ln2_b"].reshape(1, E)

    kernel = functools.partial(_transformer_layer_kernel, num_heads=H, head_size=D)

    def fixed(shape):
        nd = len(shape)
        return pl.BlockSpec(shape, lambda b, _nd=nd: (0,) * _nd)

    grid_spec = pltpu.PrefetchScalarGridSpec(
        num_scalar_prefetch=0,
        grid=(B,),                         # one (N, E) batch element per step;
        in_specs=[                         # plenty of work at real ViT sizes.
            pl.BlockSpec((1, N, E), lambda b: (b, 0, 0)),   # x
            fixed((1, E)),                                  # ln1 gamma
            fixed((1, E)),                                  # ln1 beta
            fixed((3 * HD, E)),                             # qkv weight (out,in), Q pre-scaled
            fixed((H, D, E)),                               # prj weight, head-major
            fixed((1, E)),                                  # prj bias
            fixed((1, E)),                                  # ln2 gamma
            fixed((1, E)),                                  # ln2 beta
            fixed((E, I)),                                  # mlp w1 (pre-T)
            fixed((1, I)),                                  # mlp b1
            fixed((I, E)),                                  # mlp w2 (pre-T)
            fixed((1, E)),                                  # mlp b2
        ],
        out_specs=[
            pl.BlockSpec((1, N, E), lambda b: (b, 0, 0)),
            pl.BlockSpec((1, H, N, N), lambda b: (b, 0, 0, 0)),
        ],
        scratch_shapes=[
            pltpu.VMEM((H, N, D), jnp.float32),   # q, head-major
            pltpu.VMEM((H, D, N), jnp.float32),   # k, transposed per head
            pltpu.VMEM((H, N, D), jnp.float32),   # v, head-major
        ],
    )

    flops = 2 * B * (3 * HD * E * N + 2 * H * N * N * D + N * HD * E + 2 * N * E * I)
    transcendentals = B * (H * N * N + N * I)
    bytes_accessed = 4 * (2 * B * N * E + B * H * N * N
                          + 3 * HD * E + HD * E + 2 * E * I + 6 * E + I)

    return pl.pallas_call(
        kernel,
        grid_spec=grid_spec,
        out_shape=(
            jax.ShapeDtypeStruct((B, N, E), jnp.float32),
            jax.ShapeDtypeStruct((B, H, N, N), jnp.float32),
        ),
        cost_estimate=pl.CostEstimate(
            flops=int(flops),
            transcendentals=int(transcendentals),
            bytes_accessed=int(bytes_accessed),
        ),
        compiler_params=pltpu.CompilerParams(
            dimension_semantics=("parallel",),
            vmem_limit_bytes=32 * 1024 * 1024,
        ),
    )(
        x,
        ln1_g, ln1_b,
        w_qkv, w_prj, b_prj,
        ln2_g, ln2_b,
        w1_t, b1, w2_t, b2,
    )


# ------------------------- pure-JAX reference --------------------------------
def transformer_layer_ref(x, params, *, num_heads, head_size):
    H, D = num_heads, head_size
    B, N, E = x.shape
    HD = H * D

    def ln(v, g, b):
        mu = jnp.mean(v, axis=-1, keepdims=True)
        var = jnp.mean((v - mu) ** 2, axis=-1, keepdims=True)
        return (v - mu) / jnp.sqrt(var + LN_EPS) * g + b

    xn = ln(x, params["ln1_g"], params["ln1_b"])
    qkv = xn @ params["qkv_w"].T                               # (B, N, 3HD)
    qkv = qkv.reshape(B, N, 3, H, D).transpose(2, 0, 3, 1, 4)  # (3, B, H, N, D)
    q, k, v = qkv[0], qkv[1], qkv[2]
    dots = jnp.einsum("bhnd,bhmd->bhnm", q, k) / math.sqrt(D)
    attn = jax.nn.softmax(dots, axis=-1)
    ctx = jnp.einsum("bhnm,bhmd->bhnd", attn, v)
    ctx = ctx.transpose(0, 2, 1, 3).reshape(B, N, HD)
    y = ctx @ params["prj_w"].T + params["prj_b"]
    x1 = x + y
    xn2 = ln(x1, params["ln2_g"], params["ln2_b"])
    h1 = xn2 @ params["w1"].T + params["b1"]
    h1 = h1 * 0.5 * (1.0 + lax.erf(h1 / math.sqrt(2.0)))
    out = x1 + h1 @ params["w2"].T + params["b2"]
    return out, attn


# --------------------------------- main ---------------------------------------
if __name__ == "__main__":
    B, N, E = 2, 8, 32
    H, D = 4, 8          # embedding_dim=32, num_attention_heads=4 -> head_size=8
    I = 64               # intermediate_size
    HD = H * D

    key = jax.random.PRNGKey(0)
    ks = jax.random.split(key, 8)

    stdv_qkv = 1.0 / math.sqrt(D)    # module reset_parameters
    stdv_prj = 1.0 / math.sqrt(E)
    stdv_w1 = 1.0 / math.sqrt(E)     # torch default Linear init
    stdv_w2 = 1.0 / math.sqrt(I)

    # PyTorch-native layouts: nn.Linear weight is (out_features, in_features).
    params = dict(
        ln1_g=jnp.ones((E,), jnp.float32),
        ln1_b=jnp.zeros((E,), jnp.float32),
        qkv_w=jax.random.uniform(ks[0], (3 * HD, E), jnp.float32, -stdv_qkv, stdv_qkv),
        prj_w=jax.random.uniform(ks[1], (E, HD), jnp.float32, -stdv_prj, stdv_prj),
        prj_b=jnp.zeros((E,), jnp.float32),
        ln2_g=jnp.ones((E,), jnp.float32),
        ln2_b=jnp.zeros((E,), jnp.float32),
        w1=jax.random.uniform(ks[2], (I, E), jnp.float32, -stdv_w1, stdv_w1),
        b1=jax.random.uniform(ks[3], (I,), jnp.float32, -stdv_w1, stdv_w1),
        w2=jax.random.uniform(ks[4], (E, I), jnp.float32, -stdv_w2, stdv_w2),
        b2=jax.random.uniform(ks[5], (E,), jnp.float32, -stdv_w2, stdv_w2),
    )

    x = jax.random.normal(ks[6], (B, N, E), jnp.float32)

    out, attn = transformer_layer(x, params, num_heads=H, head_size=D)
    out, attn = jax.block_until_ready((out, attn))

    out_ref, attn_ref = transformer_layer_ref(x, params, num_heads=H, head_size=D)
    assert out.shape == (B, N, E) and attn.shape == (B, H, N, N)
    assert jnp.allclose(out, out_ref, atol=1e-4, rtol=1e-4), \
        float(jnp.max(jnp.abs(out - out_ref)))
    assert jnp.allclose(attn, attn_ref, atol=2e-5, rtol=1e-4), \
        float(jnp.max(jnp.abs(attn - attn_ref)))

    print("KERNEL_OK")
</pallas_src>

<mosaic_0001>
module attributes {stable_mosaic.version = 11 : i64} {
  func.func @_transformer_layer_kernel(%arg0: i32, %arg1: memref<1x8x32xf32, #tpu.memory_space<vmem>>, %arg2: memref<1x32xf32, #tpu.memory_space<vmem>>, %arg3: memref<1x32xf32, #tpu.memory_space<vmem>>, %arg4: memref<96x32xf32, #tpu.memory_space<vmem>>, %arg5: memref<4x8x32xf32, #tpu.memory_space<vmem>>, %arg6: memref<1x32xf32, #tpu.memory_space<vmem>>, %arg7: memref<1x32xf32, #tpu.memory_space<vmem>>, %arg8: memref<1x32xf32, #tpu.memory_space<vmem>>, %arg9: memref<32x64xf32, #tpu.memory_space<vmem>>, %arg10: memref<1x64xf32, #tpu.memory_space<vmem>>, %arg11: memref<64x32xf32, #tpu.memory_space<vmem>>, %arg12: memref<1x32xf32, #tpu.memory_space<vmem>>, %arg13: memref<1x8x32xf32, #tpu.memory_space<vmem>>, %arg14: memref<1x4x8x8xf32, #tpu.memory_space<vmem>>, %arg15: memref<4x8x8xf32, #tpu.memory_space<vmem>>, %arg16: memref<4x8x8xf32, #tpu.memory_space<vmem>>, %arg17: memref<4x8x8xf32, #tpu.memory_space<vmem>>) attributes {dimension_semantics = [#tpu.dimension_semantics<parallel>], iteration_bounds = array<i64: 2>, scalar_prefetch = 0 : i64, scratch_operands = 3 : i64, tpu.core_type = #tpu.core_type<tc>, window_params = [{transform_indices = @transform_0, window_bounds = array<i64: 1, 8, 32>}, {pipeline_mode = #tpu.pipeline_mode<synchronous>, transform_indices = @transform_1, window_bounds = array<i64: 1, 32>}, {pipeline_mode = #tpu.pipeline_mode<synchronous>, transform_indices = @transform_2, window_bounds = array<i64: 1, 32>}, {pipeline_mode = #tpu.pipeline_mode<synchronous>, transform_indices = @transform_3, window_bounds = array<i64: 96, 32>}, {pipeline_mode = #tpu.pipeline_mode<synchronous>, transform_indices = @transform_4, window_bounds = array<i64: 4, 8, 32>}, {pipeline_mode = #tpu.pipeline_mode<synchronous>, transform_indices = @transform_5, window_bounds = array<i64: 1, 32>}, {pipeline_mode = #tpu.pipeline_mode<synchronous>, transform_indices = @transform_6, window_bounds = array<i64: 1, 32>}, {pipeline_mode = #tpu.pipeline_mode<synchronous>, transform_indices = @transform_7, window_bounds = array<i64: 1, 32>}, {pipeline_mode = #tpu.pipeline_mode<synchronous>, transform_indices = @transform_8, window_bounds = array<i64: 32, 64>}, {pipeline_mode = #tpu.pipeline_mode<synchronous>, transform_indices = @transform_9, window_bounds = array<i64: 1, 64>}, {pipeline_mode = #tpu.pipeline_mode<synchronous>, transform_indices = @transform_10, window_bounds = array<i64: 64, 32>}, {pipeline_mode = #tpu.pipeline_mode<synchronous>, transform_indices = @transform_11, window_bounds = array<i64: 1, 32>}, {transform_indices = @transform_12, window_bounds = array<i64: 1, 8, 32>}, {transform_indices = @transform_13, window_bounds = array<i64: 1, 4, 8, 8>}]} {
    %c0 = arith.constant 0 : index
    %c0_0 = arith.constant 0 : index
    %c0_1 = arith.constant 0 : index
    %0 = vector.load %arg1[%c0, %c0_0, %c0_1] : memref<1x8x32xf32, #tpu.memory_space<vmem>>, vector<1x8x32xf32>
    %1 = vector.shape_cast %0 : vector<1x8x32xf32> to vector<8x32xf32>
    %c0_2 = arith.constant 0 : index
    %c0_3 = arith.constant 0 : index
    %2 = vector.load %arg2[%c0_2, %c0_3] : memref<1x32xf32, #tpu.memory_space<vmem>>, vector<1x32xf32>
    %3 = vector.shape_cast %2 : vector<1x32xf32> to vector<32xf32>
    %c0_4 = arith.constant 0 : index
    %c0_5 = arith.constant 0 : index
    %4 = vector.load %arg3[%c0_4, %c0_5] : memref<1x32xf32, #tpu.memory_space<vmem>>, vector<1x32xf32>
    %5 = vector.shape_cast %4 : vector<1x32xf32> to vector<32xf32>
    %cst = arith.constant dense<0.000000e+00> : vector<8xf32>
    %6 = vector.multi_reduction <add>, %1, %cst [1] : vector<8x32xf32> to vector<8xf32>
    %7 = vector.shape_cast %6 : vector<8xf32> to vector<8x1xf32>
    %cst_6 = arith.constant 3.200000e+01 : f32
    %8 = vector.broadcast %cst_6 : f32 to vector<8x1xf32>
    %9 = arith.divf %7, %8 : vector<8x1xf32>
    %10 = vector.broadcast %9 : vector<8x1xf32> to vector<8x32xf32>
    %11 = arith.subf %1, %10 : vector<8x32xf32>
    %12 = arith.mulf %11, %11 : vector<8x32xf32>
    %cst_7 = arith.constant dense<0.000000e+00> : vector<8xf32>
    %13 = vector.multi_reduction <add>, %12, %cst_7 [1] : vector<8x32xf32> to vector<8xf32>
    %14 = vector.shape_cast %13 : vector<8xf32> to vector<8x1xf32>
    %cst_8 = arith.constant 3.200000e+01 : f32
    %15 = vector.broadcast %cst_8 : f32 to vector<8x1xf32>
    %16 = arith.divf %14, %15 : vector<8x1xf32>
    %17 = vector.broadcast %9 : vector<8x1xf32> to vector<8x32xf32>
    %18 = arith.subf %1, %17 : vector<8x32xf32>
    %cst_9 = arith.constant 9.99999974E-6 : f32
    %19 = vector.broadcast %cst_9 : f32 to vector<8x1xf32>
    %20 = arith.addf %16, %19 : vector<8x1xf32>
    %21 = math.rsqrt %20 : vector<8x1xf32>
    %22 = vector.broadcast %21 : vector<8x1xf32> to vector<8x32xf32>
    %23 = arith.mulf %18, %22 : vector<8x32xf32>
    %24 = vector.shape_cast %3 : vector<32xf32> to vector<1x32xf32>
    %25 = vector.broadcast %24 : vector<1x32xf32> to vector<8x32xf32>
    %26 = arith.mulf %23, %25 : vector<8x32xf32>
    %27 = vector.shape_cast %5 : vector<32xf32> to vector<1x32xf32>
    %28 = vector.broadcast %27 : vector<1x32xf32> to vector<8x32xf32>
    %29 = arith.addf %26, %28 : vector<8x32xf32>
    %c0_10 = arith.constant 0 : index
    %c0_11 = arith.constant 0 : index
    %30 = vector.load %arg4[%c0_10, %c0_11] : memref<96x32xf32, #tpu.memory_space<vmem>>, vector<96x32xf32>
    %cst_12 = arith.constant dense<0.000000e+00> : vector<96x8xf32>
    %31 = tpu.matmul %30, %29, %cst_12 {dimension_numbers = #tpu.dot_dimension_numbers<[1], [1], [0], [0], [0, 0, 1, 0], [], []>} : vector<96x32xf32>, vector<8x32xf32>, vector<96x8xf32> -> vector<96x8xf32>
    %32 = vector.extract_strided_slice %31 {offsets = [0, 0], sizes = [8, 8], strides = [1, 1]} : vector<96x8xf32> to vector<8x8xf32>
    %33 = tpu.transpose %32, [1, 0] : vector<8x8xf32> -> vector<8x8xf32>
    %c0_13 = arith.constant 0 : index
    %c0_14 = arith.constant 0 : index
    %c0_15 = arith.constant 0 : index
    %34 = vector.load %arg15[%c0_13, %c0_14, %c0_15] : memref<4x8x8xf32, #tpu.memory_space<vmem>>, vector<1x8x8xf32>
    %35 = vector.shape_cast %34 : vector<1x8x8xf32> to vector<8x8xf32>
    %36 = vector.shape_cast %33 : vector<8x8xf32> to vector<1x8x8xf32>
    tpu.vector_store %arg15[%c0_13, %c0_14, %c0_15], %36 {strides = array<i32>} : memref<4x8x8xf32, #tpu.memory_space<vmem>>, vector<1x8x8xf32>,
    %37 = vector.extract_strided_slice %31 {offsets = [32, 0], sizes = [8, 8], strides = [1, 1]} : vector<96x8xf32> to vector<8x8xf32>
    %c0_16 = arith.constant 0 : index
    %c0_17 = arith.constant 0 : index
    %c0_18 = arith.constant 0 : index
    %38 = vector.load %arg16[%c0_16, %c0_17, %c0_18] : memref<4x8x8xf32, #tpu.memory_space<vmem>>, vector<1x8x8xf32>
    %39 = vector.shape_cast %38 : vector<1x8x8xf32> to vector<8x8xf32>
    %40 = vector.shape_cast %37 : vector<8x8xf32> to vector<1x8x8xf32>
    tpu.vector_store %arg16[%c0_16, %c0_17, %c0_18], %40 {strides = array<i32>} : memref<4x8x8xf32, #tpu.memory_space<vmem>>, vector<1x8x8xf32>,
    %41 = vector.extract_strided_slice %31 {offsets = [64, 0], sizes = [8, 8], strides = [1, 1]} : vector<96x8xf32> to vector<8x8xf32>
    %42 = tpu.transpose %41, [1, 0] : vector<8x8xf32> -> vector<8x8xf32>
    %c0_19 = arith.constant 0 : index
    %c0_20 = arith.constant 0 : index
    %c0_21 = arith.constant 0 : index
    %43 = vector.load %arg17[%c0_19, %c0_20, %c0_21] : memref<4x8x8xf32, #tpu.memory_space<vmem>>, vector<1x8x8xf32>
    %44 = vector.shape_cast %43 : vector<1x8x8xf32> to vector<8x8xf32>
    %45 = vector.shape_cast %42 : vector<8x8xf32> to vector<1x8x8xf32>
    tpu.vector_store %arg17[%c0_19, %c0_20, %c0_21], %45 {strides = array<i32>} : memref<4x8x8xf32, #tpu.memory_space<vmem>>, vector<1x8x8xf32>,
    %46 = vector.extract_strided_slice %31 {offsets = [8, 0], sizes = [8, 8], strides = [1, 1]} : vector<96x8xf32> to vector<8x8xf32>
    %47 = tpu.transpose %46, [1, 0] : vector<8x8xf32> -> vector<8x8xf32>
    %c1 = arith.constant 1 : index
    %c0_22 = arith.constant 0 : index
    %c0_23 = arith.constant 0 : index
    %48 = vector.load %arg15[%c1, %c0_22, %c0_23] : memref<4x8x8xf32, #tpu.memory_space<vmem>>, vector<1x8x8xf32>
    %49 = vector.shape_cast %48 : vector<1x8x8xf32> to vector<8x8xf32>
    %50 = vector.shape_cast %47 : vector<8x8xf32> to vector<1x8x8xf32>
    tpu.vector_store %arg15[%c1, %c0_22, %c0_23], %50 {strides = array<i32>} : memref<4x8x8xf32, #tpu.memory_space<vmem>>, vector<1x8x8xf32>,
    %51 = vector.extract_strided_slice %31 {offsets = [40, 0], sizes = [8, 8], strides = [1, 1]} : vector<96x8xf32> to vector<8x8xf32>
    %c1_24 = arith.constant 1 : index
    %c0_25 = arith.constant 0 : index
    %c0_26 = arith.constant 0 : index
    %52 = vector.load %arg16[%c1_24, %c0_25, %c0_26] : memref<4x8x8xf32, #tpu.memory_space<vmem>>, vector<1x8x8xf32>
    %53 = vector.shape_cast %52 : vector<1x8x8xf32> to vector<8x8xf32>
    %54 = vector.shape_cast %51 : vector<8x8xf32> to vector<1x8x8xf32>
    tpu.vector_store %arg16[%c1_24, %c0_25, %c0_26], %54 {strides = array<i32>} : memref<4x8x8xf32, #tpu.memory_space<vmem>>, vector<1x8x8xf32>,
    %55 = vector.extract_strided_slice %31 {offsets = [72, 0], sizes = [8, 8], strides = [1, 1]} : vector<96x8xf32> to vector<8x8xf32>
    %56 = tpu.transpose %55, [1, 0] : vector<8x8xf32> -> vector<8x8xf32>
    %c1_27 = arith.constant 1 : index
    %c0_28 = arith.constant 0 : index
    %c0_29 = arith.constant 0 : index
    %57 = vector.load %arg17[%c1_27, %c0_28, %c0_29] : memref<4x8x8xf32, #tpu.memory_space<vmem>>, vector<1x8x8xf32>
    %58 = vector.shape_cast %57 : vector<1x8x8xf32> to vector<8x8xf32>
    %59 = vector.shape_cast %56 : vector<8x8xf32> to vector<1x8x8xf32>
    tpu.vector_store %arg17[%c1_27, %c0_28, %c0_29], %59 {strides = array<i32>} : memref<4x8x8xf32, #tpu.memory_space<vmem>>, vector<1x8x8xf32>,
    %60 = vector.extract_strided_slice %31 {offsets = [16, 0], sizes = [8, 8], strides = [1, 1]} : vector<96x8xf32> to vector<8x8xf32>
    %61 = tpu.transpose %60, [1, 0] : vector<8x8xf32> -> vector<8x8xf32>
    %c2 = arith.constant 2 : index
    %c0_30 = arith.constant 0 : index
    %c0_31 = arith.constant 0 : index
    %62 = vector.load %arg15[%c2, %c0_30, %c0_31] : memref<4x8x8xf32, #tpu.memory_space<vmem>>, vector<1x8x8xf32>
    %63 = vector.shape_cast %62 : vector<1x8x8xf32> to vector<8x8xf32>
    %64 = vector.shape_cast %61 : vector<8x8xf32> to vector<1x8x8xf32>
    tpu.vector_store %arg15[%c2, %c0_30, %c0_31], %64 {strides = array<i32>} : memref<4x8x8xf32, #tpu.memory_space<vmem>>, vector<1x8x8xf32>,
    %65 = vector.extract_strided_slice %31 {offsets = [48, 0], sizes = [8, 8], strides = [1, 1]} : vector<96x8xf32> to vector<8x8xf32>
    %c2_32 = arith.constant 2 : index
    %c0_33 = arith.constant 0 : index
    %c0_34 = arith.constant 0 : index
    %66 = vector.load %arg16[%c2_32, %c0_33, %c0_34] : memref<4x8x8xf32, #tpu.memory_space<vmem>>, vector<1x8x8xf32>
    %67 = vector.shape_cast %66 : vector<1x8x8xf32> to vector<8x8xf32>
    %68 = vector.shape_cast %65 : vector<8x8xf32> to vector<1x8x8xf32>
    tpu.vector_store %arg16[%c2_32, %c0_33, %c0_34], %68 {strides = array<i32>} : memref<4x8x8xf32, #tpu.memory_space<vmem>>, vector<1x8x8xf32>,
    %69 = vector.extract_strided_slice %31 {offsets = [80, 0], sizes = [8, 8], strides = [1, 1]} : vector<96x8xf32> to vector<8x8xf32>
    %70 = tpu.transpose %69, [1, 0] : vector<8x8xf32> -> vector<8x8xf32>
    %c2_35 = arith.constant 2 : index
    %c0_36 = arith.constant 0 : index
    %c0_37 = arith.constant 0 : index
    %71 = vector.load %arg17[%c2_35, %c0_36, %c0_37] : memref<4x8x8xf32, #tpu.memory_space<vmem>>, vector<1x8x8xf32>
    %72 = vector.shape_cast %71 : vector<1x8x8xf32> to vector<8x8xf32>
    %73 = vector.shape_cast %70 : vector<8x8xf32> to vector<1x8x8xf32>
    tpu.vector_store %arg17[%c2_35, %c0_36, %c0_37], %73 {strides = array<i32>} : memref<4x8x8xf32, #tpu.memory_space<vmem>>, vector<1x8x8xf32>,
    %74 = vector.extract_strided_slice %31 {offsets = [24, 0], sizes = [8, 8], strides = [1, 1]} : vector<96x8xf32> to vector<8x8xf32>
    %75 = tpu.transpose %74, [1, 0] : vector<8x8xf32> -> vector<8x8xf32>
    %c3 = arith.constant 3 : index
    %c0_38 = arith.constant 0 : index
    %c0_39 = arith.constant 0 : index
    %76 = vector.load %arg15[%c3, %c0_38, %c0_39] : memref<4x8x8xf32, #tpu.memory_space<vmem>>, vector<1x8x8xf32>
    %77 = vector.shape_cast %76 : vector<1x8x8xf32> to vector<8x8xf32>
    %78 = vector.shape_cast %75 : vector<8x8xf32> to vector<1x8x8xf32>
    tpu.vector_store %arg15[%c3, %c0_38, %c0_39], %78 {strides = array<i32>} : memref<4x8x8xf32, #tpu.memory_space<vmem>>, vector<1x8x8xf32>,
    %79 = vector.extract_strided_slice %31 {offsets = [56, 0], sizes = [8, 8], strides = [1, 1]} : vector<96x8xf32> to vector<8x8xf32>
    %c3_40 = arith.constant 3 : index
    %c0_41 = arith.constant 0 : index
    %c0_42 = arith.constant 0 : index
    %80 = vector.load %arg16[%c3_40, %c0_41, %c0_42] : memref<4x8x8xf32, #tpu.memory_space<vmem>>, vector<1x8x8xf32>
    %81 = vector.shape_cast %80 : vector<1x8x8xf32> to vector<8x8xf32>
    %82 = vector.shape_cast %79 : vector<8x8xf32> to vector<1x8x8xf32>
    tpu.vector_store %arg16[%c3_40, %c0_41, %c0_42], %82 {strides = array<i32>} : memref<4x8x8xf32, #tpu.memory_space<vmem>>, vector<1x8x8xf32>,
    %83 = vector.extract_strided_slice %31 {offsets = [88, 0], sizes = [8, 8], strides = [1, 1]} : vector<96x8xf32> to vector<8x8xf32>
    %84 = tpu.transpose %83, [1, 0] : vector<8x8xf32> -> vector<8x8xf32>
    %c3_43 = arith.constant 3 : index
    %c0_44 = arith.constant 0 : index
    %c0_45 = arith.constant 0 : index
    %85 = vector.load %arg17[%c3_43, %c0_44, %c0_45] : memref<4x8x8xf32, #tpu.memory_space<vmem>>, vector<1x8x8xf32>
    %86 = vector.shape_cast %85 : vector<1x8x8xf32> to vector<8x8xf32>
    %87 = vector.shape_cast %84 : vector<8x8xf32> to vector<1x8x8xf32>
    tpu.vector_store %arg17[%c3_43, %c0_44, %c0_45], %87 {strides = array<i32>} : memref<4x8x8xf32, #tpu.memory_space<vmem>>, vector<1x8x8xf32>,
    %c0_46 = arith.constant 0 : index
    %c0_47 = arith.constant 0 : index
    %c0_48 = arith.constant 0 : index
    %88 = vector.load %arg15[%c0_46, %c0_47, %c0_48] : memref<4x8x8xf32, #tpu.memory_space<vmem>>, vector<4x8x8xf32>
    %c0_49 = arith.constant 0 : index
    %c0_50 = arith.constant 0 : index
    %c0_51 = arith.constant 0 : index
    %89 = vector.load %arg16[%c0_49, %c0_50, %c0_51] : memref<4x8x8xf32, #tpu.memory_space<vmem>>, vector<4x8x8xf32>
    %c0_52 = arith.constant 0 : index
    %c0_53 = arith.constant 0 : index
    %c0_54 = arith.constant 0 : index
    %90 = vector.load %arg17[%c0_52, %c0_53, %c0_54] : memref<4x8x8xf32, #tpu.memory_space<vmem>>, vector<4x8x8xf32>
    "tpu.trace_start"() <{level = 10 : i32, message = "hnd,hdm->hnm"}> : () -> ()
    %cst_55 = arith.constant dense<0.000000e+00> : vector<4x8x8xf32>
    %91 = tpu.matmul %88, %89, %cst_55 {dimension_numbers = #tpu.dot_dimension_numbers<[2], [1], [1], [2], [0, 0, 0, 1, 1, 2], [0], [0]>} : vector<4x8x8xf32>, vector<4x8x8xf32>, vector<4x8x8xf32> -> vector<4x8x8xf32>
    "tpu.trace_stop"() : () -> ()
    %cst_56 = arith.constant dense<0xFF800000> : vector<4x8xf32>
    %92 = vector.multi_reduction <maximumf>, %91, %cst_56 [2] : vector<4x8x8xf32> to vector<4x8xf32>
    %93 = vector.shape_cast %92 : vector<4x8xf32> to vector<4x8x1xf32>
    %94 = vector.broadcast %93 : vector<4x8x1xf32> to vector<4x8x8xf32>
    %95 = arith.subf %91, %94 : vector<4x8x8xf32>
    %96 = math.exp %95 : vector<4x8x8xf32>
    %cst_57 = arith.constant dense<0.000000e+00> : vector<4x8xf32>
    %97 = vector.multi_reduction <add>, %96, %cst_57 [2] : vector<4x8x8xf32> to vector<4x8xf32>
    %98 = vector.shape_cast %97 : vector<4x8xf32> to vector<4x8x1xf32>
    %99 = tpu.reciprocal %98 : vector<4x8x1xf32> -> vector<4x8x1xf32>
    %100 = vector.broadcast %99 : vector<4x8x1xf32> to vector<4x8x8xf32>
    %101 = arith.mulf %96, %100 : vector<4x8x8xf32>
    %c0_58 = arith.constant 0 : index
    %c0_59 = arith.constant 0 : index
    %c0_60 = arith.constant 0 : index
    %c0_61 = arith.constant 0 : index
    %102 = vector.load %arg14[%c0_58, %c0_59, %c0_60, %c0_61] : memref<1x4x8x8xf32, #tpu.memory_space<vmem>>, vector<1x4x8x8xf32>
    %103 = vector.shape_cast %102 : vector<1x4x8x8xf32> to vector<4x8x8xf32>
    %104 = vector.shape_cast %101 : vector<4x8x8xf32> to vector<1x4x8x8xf32>
    tpu.vector_store %arg14[%c0_58, %c0_59, %c0_60, %c0_61], %104 {strides = array<i32>} : memref<1x4x8x8xf32, #tpu.memory_space<vmem>>, vector<1x4x8x8xf32>,
    "tpu.trace_start"() <{level = 10 : i32, message = "hnm,hmd->hnd"}> : () -> ()
    %cst_62 = arith.constant dense<0.000000e+00> : vector<4x8x8xf32>
    %105 = tpu.matmul %101, %90, %cst_62 {dimension_numbers = #tpu.dot_dimension_numbers<[2], [1], [1], [2], [0, 0, 0, 1, 1, 2], [0], [0]>} : vector<4x8x8xf32>, vector<4x8x8xf32>, vector<4x8x8xf32> -> vector<4x8x8xf32>
    "tpu.trace_stop"() : () -> ()
    %c0_63 = arith.constant 0 : index
    %c0_64 = arith.constant 0 : index
    %c0_65 = arith.constant 0 : index
    %106 = vector.load %arg5[%c0_63, %c0_64, %c0_65] : memref<4x8x32xf32, #tpu.memory_space<vmem>>, vector<4x8x32xf32>
    "tpu.trace_start"() <{level = 10 : i32, message = "hnd,hde->hne"}> : () -> ()
    %cst_66 = arith.constant dense<0.000000e+00> : vector<4x8x32xf32>
    %107 = tpu.matmul %105, %106, %cst_66 {dimension_numbers = #tpu.dot_dimension_numbers<[2], [1], [1], [2], [0, 0, 0, 1, 1, 2], [0], [0]>} : vector<4x8x8xf32>, vector<4x8x32xf32>, vector<4x8x32xf32> -> vector<4x8x32xf32>
    "tpu.trace_stop"() : () -> ()
    %cst_67 = arith.constant dense<0.000000e+00> : vector<8x32xf32>
    %108 = vector.multi_reduction <add>, %107, %cst_67 [0] : vector<4x8x32xf32> to vector<8x32xf32>
    %109 = arith.addf %1, %108 : vector<8x32xf32>
    %c0_68 = arith.constant 0 : index
    %c0_69 = arith.constant 0 : index
    %110 = vector.load %arg6[%c0_68, %c0_69] : memref<1x32xf32, #tpu.memory_space<vmem>>, vector<1x32xf32>
    %111 = vector.shape_cast %110 : vector<1x32xf32> to vector<32xf32>
    %112 = vector.shape_cast %111 : vector<32xf32> to vector<1x32xf32>
    %113 = vector.broadcast %112 : vector<1x32xf32> to vector<8x32xf32>
    %114 = arith.addf %109, %113 : vector<8x32xf32>
    %c0_70 = arith.constant 0 : index
    %c0_71 = arith.constant 0 : index
    %115 = vector.load %arg7[%c0_70, %c0_71] : memref<1x32xf32, #tpu.memory_space<vmem>>, vector<1x32xf32>
    %116 = vector.shape_cast %115 : vector<1x32xf32> to vector<32xf32>
    %c0_72 = arith.constant 0 : index
    %c0_73 = arith.constant 0 : index
    %117 = vector.load %arg8[%c0_72, %c0_73] : memref<1x32xf32, #tpu.memory_space<vmem>>, vector<1x32xf32>
    %118 = vector.shape_cast %117 : vector<1x32xf32> to vector<32xf32>
    %cst_74 = arith.constant dense<0.000000e+00> : vector<8xf32>
    %119 = vector.multi_reduction <add>, %114, %cst_74 [1] : vector<8x32xf32> to vector<8xf32>
    %120 = vector.shape_cast %119 : vector<8xf32> to vector<8x1xf32>
    %cst_75 = arith.constant 3.200000e+01 : f32
    %121 = vector.broadcast %cst_75 : f32 to vector<8x1xf32>
    %122 = arith.divf %120, %121 : vector<8x1xf32>
    %123 = vector.broadcast %122 : vector<8x1xf32> to vector<8x32xf32>
    %124 = arith.subf %114, %123 : vector<8x32xf32>
    %125 = arith.mulf %124, %124 : vector<8x32xf32>
    %cst_76 = arith.constant dense<0.000000e+00> : vector<8xf32>
    %126 = vector.multi_reduction <add>, %125, %cst_76 [1] : vector<8x32xf32> to vector<8xf32>
    %127 = vector.shape_cast %126 : vector<8xf32> to vector<8x1xf32>
    %cst_77 = arith.constant 3.200000e+01 : f32
    %128 = vector.broadcast %cst_77 : f32 to vector<8x1xf32>
    %129 = arith.divf %127, %128 : vector<8x1xf32>
    %130 = vector.broadcast %122 : vector<8x1xf32> to vector<8x32xf32>
    %131 = arith.subf %114, %130 : vector<8x32xf32>
    %cst_78 = arith.constant 9.99999974E-6 : f32
    %132 = vector.broadcast %cst_78 : f32 to vector<8x1xf32>
    %133 = arith.addf %129, %132 : vector<8x1xf32>
    %134 = math.rsqrt %133 : vector<8x1xf32>
    %135 = vector.broadcast %134 : vector<8x1xf32> to vector<8x32xf32>
    %136 = arith.mulf %131, %135 : vector<8x32xf32>
    %137 = vector.shape_cast %116 : vector<32xf32> to vector<1x32xf32>
    %138 = vector.broadcast %137 : vector<1x32xf32> to vector<8x32xf32>
    %139 = arith.mulf %136, %138 : vector<8x32xf32>
    %140 = vector.shape_cast %118 : vector<32xf32> to vector<1x32xf32>
    %141 = vector.broadcast %140 : vector<1x32xf32> to vector<8x32xf32>
    %142 = arith.addf %139, %141 : vector<8x32xf32>
    %c0_79 = arith.constant 0 : index
    %c0_80 = arith.constant 0 : index
    %143 = vector.load %arg9[%c0_79, %c0_80] : memref<32x64xf32, #tpu.memory_space<vmem>>, vector<32x64xf32>
    %cst_81 = arith.constant dense<0.000000e+00> : vector<8x64xf32>
    %144 = tpu.matmul %142, %143, %cst_81 {dimension_numbers = #tpu.dot_dimension_numbers<[1], [0], [0], [1], [0, 0, 1, 1], [], []>} : vector<8x32xf32>, vector<32x64xf32>, vector<8x64xf32> -> vector<8x64xf32>
    %c0_82 = arith.constant 0 : index
    %c0_83 = arith.constant 0 : index
    %145 = vector.load %arg10[%c0_82, %c0_83] : memref<1x64xf32, #tpu.memory_space<vmem>>, vector<1x64xf32>
    %146 = vector.shape_cast %145 : vector<1x64xf32> to vector<64xf32>
    %147 = vector.shape_cast %146 : vector<64xf32> to vector<1x64xf32>
    %148 = vector.broadcast %147 : vector<1x64xf32> to vector<8x64xf32>
    %149 = arith.addf %144, %148 : vector<8x64xf32>
    %cst_84 = arith.constant 5.000000e-01 : f32
    %150 = vector.broadcast %cst_84 : f32 to vector<8x64xf32>
    %151 = arith.mulf %149, %150 : vector<8x64xf32>
    %cst_85 = arith.constant 0.707106769 : f32
    %152 = vector.broadcast %cst_85 : f32 to vector<8x64xf32>
    %153 = arith.mulf %149, %152 : vector<8x64xf32>
    %154 = math.erf %153 : vector<8x64xf32>
    %cst_86 = arith.constant 1.000000e+00 : f32
    %155 = vector.broadcast %cst_86 : f32 to vector<8x64xf32>
    %156 = arith.addf %155, %154 : vector<8x64xf32>
    %157 = arith.mulf %151, %156 : vector<8x64xf32>
    %c0_87 = arith.constant 0 : index
    %c0_88 = arith.constant 0 : index
    %158 = vector.load %arg11[%c0_87, %c0_88] : memref<64x32xf32, #tpu.memory_space<vmem>>, vector<64x32xf32>
    %cst_89 = arith.constant dense<0.000000e+00> : vector<8x32xf32>
    %159 = tpu.matmul %157, %158, %cst_89 {dimension_numbers = #tpu.dot_dimension_numbers<[1], [0], [0], [1], [0, 0, 1, 1], [], []>} : vector<8x64xf32>, vector<64x32xf32>, vector<8x32xf32> -> vector<8x32xf32>
    %160 = arith.addf %114, %159 : vector<8x32xf32>
    %c0_90 = arith.constant 0 : index
    %c0_91 = arith.constant 0 : index
    %161 = vector.load %arg12[%c0_90, %c0_91] : memref<1x32xf32, #tpu.memory_space<vmem>>, vector<1x32xf32>
    %162 = vector.shape_cast %161 : vector<1x32xf32> to vector<32xf32>
    %163 = vector.shape_cast %162 : vector<32xf32> to vector<1x32xf32>
    %164 = vector.broadcast %163 : vector<1x32xf32> to vector<8x32xf32>
    %165 = arith.addf %160, %164 : vector<8x32xf32>
    %c0_92 = arith.constant 0 : index
    %c0_93 = arith.constant 0 : index
    %c0_94 = arith.constant 0 : index
    %166 = vector.load %arg13[%c0_92, %c0_93, %c0_94] : memref<1x8x32xf32, #tpu.memory_space<vmem>>, vector<1x8x32xf32>
    %167 = vector.shape_cast %166 : vector<1x8x32xf32> to vector<8x32xf32>
    %168 = vector.shape_cast %165 : vector<8x32xf32> to vector<1x8x32xf32>
    tpu.vector_store %arg13[%c0_92, %c0_93, %c0_94], %168 {strides = array<i32>} : memref<1x8x32xf32, #tpu.memory_space<vmem>>, vector<1x8x32xf32>,
    return
  }
  func.func @transform_0(%arg0: i32) -> (i32, i32, i32) {
    %c0_i32 = arith.constant 0 : i32
    %c0_i32_0 = arith.constant 0 : i32
    %c0_i32_1 = arith.constant 0 : i32
    return %arg0, %c0_i32, %c0_i32_0 : i32, i32, i32
  }
  func.func @transform_1(%arg0: i32) -> (i32, i32) {
    %c0_i32 = arith.constant 0 : i32
    %c0_i32_0 = arith.constant 0 : i32
    %c0_i32_1 = arith.constant 0 : i32
    return %c0_i32, %c0_i32_0 : i32, i32
  }
  func.func @transform_2(%arg0: i32) -> (i32, i32) {
    %c0_i32 = arith.constant 0 : i32
    %c0_i32_0 = arith.constant 0 : i32
    %c0_i32_1 = arith.constant 0 : i32
    return %c0_i32, %c0_i32_0 : i32, i32
  }
  func.func @transform_3(%arg0: i32) -> (i32, i32) {
    %c0_i32 = arith.constant 0 : i32
    %c0_i32_0 = arith.constant 0 : i32
    %c0_i32_1 = arith.constant 0 : i32
    return %c0_i32, %c0_i32_0 : i32, i32
  }
  func.func @transform_4(%arg0: i32) -> (i32, i32, i32) {
    %c0_i32 = arith.constant 0 : i32
    %c0_i32_0 = arith.constant 0 : i32
    %c0_i32_1 = arith.constant 0 : i32
    %c0_i32_2 = arith.constant 0 : i32
    return %c0_i32, %c0_i32_0, %c0_i32_1 : i32, i32, i32
  }
  func.func @transform_5(%arg0: i32) -> (i32, i32) {
    %c0_i32 = arith.constant 0 : i32
    %c0_i32_0 = arith.constant 0 : i32
    %c0_i32_1 = arith.constant 0 : i32
    return %c0_i32, %c0_i32_0 : i32, i32
  }
  func.func @transform_6(%arg0: i32) -> (i32, i32) {
    %c0_i32 = arith.constant 0 : i32
    %c0_i32_0 = arith.constant 0 : i32
    %c0_i32_1 = arith.constant 0 : i32
    return %c0_i32, %c0_i32_0 : i32, i32
  }
  func.func @transform_7(%arg0: i32) -> (i32, i32) {
    %c0_i32 = arith.constant 0 : i32
    %c0_i32_0 = arith.constant 0 : i32
    %c0_i32_1 = arith.constant 0 : i32
    return %c0_i32, %c0_i32_0 : i32, i32
  }
  func.func @transform_8(%arg0: i32) -> (i32, i32) {
    %c0_i32 = arith.constant 0 : i32
    %c0_i32_0 = arith.constant 0 : i32
    %c0_i32_1 = arith.constant 0 : i32
    return %c0_i32, %c0_i32_0 : i32, i32
  }
  func.func @transform_9(%arg0: i32) -> (i32, i32) {
    %c0_i32 = arith.constant 0 : i32
    %c0_i32_0 = arith.constant 0 : i32
    %c0_i32_1 = arith.constant 0 : i32
    return %c0_i32, %c0_i32_0 : i32, i32
  }
  func.func @transform_10(%arg0: i32) -> (i32, i32) {
    %c0_i32 = arith.constant 0 : i32
    %c0_i32_0 = arith.constant 0 : i32
    %c0_i32_1 = arith.constant 0 : i32
    return %c0_i32, %c0_i32_0 : i32, i32
  }
  func.func @transform_11(%arg0: i32) -> (i32, i32) {
    %c0_i32 = arith.constant 0 : i32
    %c0_i32_0 = arith.constant 0 : i32
    %c0_i32_1 = arith.constant 0 : i32
    return %c0_i32, %c0_i32_0 : i32, i32
  }
  func.func @transform_12(%arg0: i32) -> (i32, i32, i32) {
    %c0_i32 = arith.constant 0 : i32
    %c0_i32_0 = arith.constant 0 : i32
    %c0_i32_1 = arith.constant 0 : i32
    return %arg0, %c0_i32, %c0_i32_0 : i32, i32, i32
  }
  func.func @transform_13(%arg0: i32) -> (i32, i32, i32, i32) {
    %c0_i32 = arith.constant 0 : i32
    %c0_i32_0 = arith.constant 0 : i32
    %c0_i32_1 = arith.constant 0 : i32
    %c0_i32_2 = arith.constant 0 : i32
    return %arg0, %c0_i32, %c0_i32_0, %c0_i32_1 : i32, i32, i32, i32
  }
}

</mosaic_0001>

<bundles_post_ra>
// kernel: tpu_custom_call.1
= control target key start
LH: loop header
LB: loop body
LE: loop exit
PB: predicated region body
PF: predicated region fallthrough
CT: control target
= control target key end

     0   :  { %s3060_s0 = inlined_call_operand.vmem [shape: f32[2,8,32], index: 0, kind: input, shape index: {}]   ;;  %s3061_s1 = inlined_call_operand.vmem [shape: f32[1,32], index: 1, kind: input, shape index: {}]   ;;  %s3062_s2 = inlined_call_operand.vmem [shape: f32[1,32], index: 2, kind: input, shape index: {}]   ;;  %s3063_s3 = inlined_call_operand.vmem [shape: f32[96,32], index: 3, kind: input, shape index: {}]   ;;  %s3064_s4 = inlined_call_operand.vmem [shape: f32[4,8,32], index: 4, kind: input, shape index: {}]   ;;  %s3065_s5 = inlined_call_operand.vmem [shape: f32[1,32], index: 5, kind: input, shape index: {}]   ;;  %s3066_s6 = inlined_call_operand.vmem [shape: f32[1,32], index: 6, kind: input, shape index: {}]   ;;  %s3067_s7 = inlined_call_operand.vmem [shape: f32[1,32], index: 7, kind: input, shape index: {}]   ;;  %s3068_s8 = inlined_call_operand.vmem [shape: f32[32,64], index: 8, kind: input, shape index: {}]   ;;  %s3069_s9 = inlined_call_operand.vmem [shape: f32[1,64], index: 9, kind: input, shape index: {}]   ;;  %s3070_s10 = inlined_call_operand.vmem [shape: f32[64,32], index: 10, kind: input, shape index: {}]   ;;  %s3071_s11 = inlined_call_operand.vmem [shape: f32[1,32], index: 11, kind: input, shape index: {}]   ;;  %s3072_s12 = inlined_call_operand.hbm [shape: f32[2,8,32], index: 12, kind: output, shape index: {0}]   ;;  %s3073_s13 = inlined_call_operand.hbm [shape: f32[2,4,8,8], index: 13, kind: output, shape index: {1}]  }
   0x1   :  { %3074 = sst [smem:[#allocation11_spill]] %s3060_s0 }
   0x2   :  { %3075 = sst [smem:[#allocation12_spill]] %s3061_s1 }
   0x3   :  { %3076 = sst [smem:[#allocation13_spill]] %s3062_s2 }
   0x4   :  { %3077 = sst [smem:[#allocation14_spill]] %s3063_s3 }
   0x5   :  { %3078 = sst [smem:[#allocation15_spill]] %s3064_s4 }
   0x6   :  { %3079 = sst [smem:[#allocation16_spill]] %s3065_s5 }
   0x7   :  { %3080 = sst [smem:[#allocation17_spill]] %s3066_s6 }
   0x8   :  { %19 = vsyncpa [#allocation6], 0 }
   0x9   :  { %21 = vsyncpa [#allocation6 + $0x1], 0 }
   0xa   :  { %22 = vsyncpa [#allocation8], 0 }
   0xb   :  { %24 = vsyncpa [#allocation8 + $0x1], 0  ;;  %s2699_s25 = smov 0   ;;  %s2701_s26 = smov 0  }
   0xc   :  { %s2703_s27 = smov 0   ;;  %s2705_s28 = smov 0  }
   0xd LB: > { %s2720_s29 = sadd.s32 4294967295, %s2620_s28   ;;  %s2225_s30 = sadd.s32 4294967294, %s2620_s28   ;;  %s2620_s28 = sphi %s2705_s28, %s3094_s28   ;;  %s2616_s27 = sphi %s2703_s27, %s3093_s27   ;;  %s2612_s26 = sphi %s2701_s26, %s3092_s26   ;;  %s2608_s25 = sphi %s2699_s25, %s3091_s25  }
   0xe   : > { %s2724_s14 = sadd.s32 1, %s2620_s28   ;;  %s294_s15 = sadd.s32 1, %s2616_s27 }
   0xf   : > { %s291_s16 = ssub.s32 %s2620_s28, %s2724_s14  ;;  %p304_p0 = scmp.ne.s32.totalorder %s2616_s27, %s2612_s26 }
  0x10   : > { %p292_p1 = scmp.eq.s32.totalorder %s291_s16, 0  ;;  %p305_p2 = scmp.eq.s32.totalorder %s2720_s29, 1 }
  0x11   : > { %p310_p3 = scmp.ne.s32.totalorder %s2612_s26, %s2608_s25  ;;  %p311_p4 = scmp.eq.s32.totalorder %s2225_s30, 1 }
  0x12   : > { %s2735_s17 = scalar_select %p292_p1, %s2616_s27, %s294_s15  }
  0x13   : > { %p2737_p5 = por %p305_p2, %p304_p0  ;;  %p2741_p6 = por %p311_p4, %p310_p3 }
  0x14   : > { %p2228_p7 = scmp.ge.s32.totalorder %s2620_s28, 1  ;;  %p395_p8 = scmp.lt.s32.totalorder %s2620_s28, 3 }
  0x16   : > { %p396_p9 = pnand %p2228_p7, %p395_p8 }
  0x17   : > { %p443_p10 = scmp.lt.s32.totalorder (!%p396_p9), %s2720_s29, 1  ;;  %vm450_vm0 = vcmask (!%p396_p9), 261120   ;;  %s3083_s0 = sld [smem:[#allocation11_spill]] (!%p396_p9)  ;;  %vm687_vm1 = vcmask (!%p396_p9), 64512   ;;  %v2622_v33 = vmov (!%p396_p9), 0.0   ;;  %vm2623_vm2 = vmmov (!%p396_p9), 0  }
  0x18   : > { %399 = sbr.rel (%p396_p9) target bundleno = 2480 (0x9b0), region = 68  ;;  %s3084_s3 = sld [smem:[#allocation14_spill]] (!%p396_p9)  ;;  %vm2015_vm3 = vcmask (!%p396_p9), 523264  }
  0x19   : > { %s3085_s1 = sld [smem:[#allocation12_spill]] (!%p396_p9)  ;;  %s3086_s2 = sld [smem:[#allocation13_spill]] (!%p396_p9) }
  0x1a   : > { %s3087_s4 = sld [smem:[#allocation15_spill]] (!%p396_p9)  ;;  %s3088_s5 = sld [smem:[#allocation16_spill]] (!%p396_p9) }
  0x1b   : > { %s3089_s6 = sld [smem:[#allocation17_spill]] (!%p396_p9)  ;;  %s2273_s16 = sshll.u32 (!%p396_p9), %s2720_s29, 9 }
  0x1e   : > { %v479_v7 = vld [vmem:[%s3084_s3] sm:$0xff] (!%p396_p9)  ;;  %v480_v17 = vld [vmem:[%s3084_s3 + $0x8] sm:$0xff] (!%p396_p9)  ;;  %v481_v18 = vld [vmem:[%s3084_s3 + $0x10] sm:$0xff] (!%p396_p9) }
  0x1f   : > { %s444_s20 = scalar_select %p443_p10, %s2720_s29, 1  ;;  %2327 = vmatprep.mubr.msk.f32.mxu0 %vm450_vm0, %v479_v7  ;;  %v2232_v12 = vld [vmem:[%s3085_s1] ss:$0 sm:$0xff]  ;;  %v482_v19 = vld [vmem:[%s3084_s3 + $0x18] sm:$0xff]  ;;  %v484_v21 = vld [vmem:[%s3084_s3 + $0x28] sm:$0xff] }
  0x20   : > { %v2233_v14 = vld [vmem:[%s3086_s2] ss:$0 sm:$0xff]  ;;  %v485_v22 = vld [vmem:[%s3084_s3 + $0x30] sm:$0xff]  ;;  %v486_v23 = vld [vmem:[%s3084_s3 + $0x38] sm:$0xff]  ;;  %s2625_s1 = smov [#allocation7]  }
  0x21   : > { %s2231_s21 = sshll.u32 %s444_s20, 3  ;;  %v483_v20 = vld [vmem:[%s3084_s3 + $0x20] sm:$0xff]  ;;  %v488_v25 = vld [vmem:[%s3084_s3 + $0x48] sm:$0xff]  ;;  %v489_v28 = vld [vmem:[%s3084_s3 + $0x50] sm:$0xff]  ;;  %s2530_s2 = sshll.u32 %s2625_s1, 4  ;;  %s2531_s2 = int_to_ptr.vmem [resolvable:$false] %s2530_s2 }
  0x22   : > { %s446_s24 = scalar_lea.vmem %s3083_s0, %s2231_s21  ;;  %v487_v24 = vld [vmem:[%s3084_s3 + $0x40] sm:$0xff]  ;;  %v490_v29 = vld [vmem:[%s3084_s3 + $0x58] sm:$0xff]  ;;  %2342 = vmatprep.mubr.msk.f32.mxu1 %vm450_vm0, %v489_v28  ;;  %s2859_s21 = sand.u32 1, %s2612_s26  }
  0x23   : > { %v2752_v0 = vld [vmem:[%s446_s24] sm:$0xff]  ;;  %s2230_s22 = sshll.u32 %s2859_s21, 5  ;;  %s2981_s24 = scalar_lea.hbm %s3073_s13, %s2273_s16 }
  0x24   : > { %v451_v1 = vsel %vm450_vm0, %v2752_v0, 0.0  ;;  %s2863_s23 = scalar_lea.vmem [#allocation7], %s2230_s22 }
  0x25   : > { %452 = vadd.xlane.f32.xlu0 %v451_v1  ;;  %s2131_s15 = sshll.u32 %s2863_s23, 4  ;;  %s2976_s15 = int_to_ptr.vmem [resolvable:$true] %s2131_s15 }
  0x26   : > { %s2526_s0 = scalar_lea.vmem %s2976_s15, 512  ;;  %p2533_p0 = scmp.lt.s32.totalorder %s2976_s15, %s2531_s2 }
  0x27   : > { %p2527_p11 = scmp.ne.s32.totalorder %s2976_s15, %s2526_s0 }
  0x29   : > { %p2528_p12 = pnand %p2527_p11, %p2737_p5 }
  0x2b   : > { %p2529_p13 = pneg %p2528_p12 }
  0xb2   : > { %v453_v2 = vpop.xlane.xlu0 %452 }
  0xb3   : > { %v455_v3 = vmul.f32 0.03125, %v453_v2 }
  0xb5   : > { %v456_v4 = vsub.f32 %v2752_v0, %v455_v3 }
  0xb7   : > { %v457_v5 = vmul.f32 %v456_v4, %v456_v4 }
  0xb9   : > { %v458_v6 = vsel %vm450_vm0, %v457_v5, 0.0 }
  0xba   : > { %459 = vadd.xlane.f32.xlu0 %v458_v6 }
 0x147   : > { %v460_v8 = vpop.xlane.xlu0 %459 }
 0x148   : > { %v461_v9 = vmul.f32 0.03125, %v460_v8 }
 0x14a   : > { %v462_v10 = vadd.f32 1e-05, %v461_v9 }
 0x14c   : > { %2504 = vrsqrt.f32 %v462_v10 }
 0x156   : > { %v2505_v11 = vpop.eup %2504 }
 0x157   : > { %v464_v13 = vmul.f32 %v2505_v11, %v456_v4 }
 0x159   : > { %v471_v15 = vmul.f32 %v2232_v12, %v464_v13 }
 0x15b   : > { %v478_v16 = vadd.f32 %v2233_v14, %v471_v15 }
 0x15d   : > { %2325 = vmatprep.subr.msk.mxu0 %vm450_vm0, %v478_v16  ;;  %2453 = vmatprep.subr.msk.mxu1 %vm450_vm0, %v478_v16 }
 0x15e   : > { %2326 = vmatpush3.xpose.msk.msra.mxu0 %vm450_vm0, %v478_v16  ;;  %2454 = vmatpush3.xpose.msk.msra.mxu1 %vm450_vm0, %v478_v16 }
 0x15f   : > { %2345 = vmatprep.subr.mxu1 %v2622_v33  ;;  %2380 = vmatprep.subr.mxu0 %v2622_v33 }
 0x161   : > { %2328 = vmatmul.mubr.msk.f32.vlgmr.msra.gmra.mrb[0].mxu0 %vm450_vm0, %v480_v17  ;;  %2343 = vmatmul.mubr.msk.f32.vlgmr.msra.gmra.mrb[0].mxu1 %vm450_vm0, %v490_v29 }
 0x162   : > { %2330 = vmatprep.mubr.msk.f32.mxu0 %vm450_vm0, %v481_v18  ;;  %2347 = vmatprep.mubr.msk.f32.mxu1 %vm2623_vm2, %v2622_v33 }
 0x165   : > { %2331 = vmatmul.mubr.msk.f32.gmra.mrb[2].mxu0 %vm450_vm0, %v482_v19 }
 0x166   : > { %2333 = vmatprep.mubr.msk.f32.mxu0 %vm450_vm0, %v483_v20 }
 0x169   : > { %2334 = vmatmul.mubr.msk.f32.gmra.mrb[4].mxu0 %vm450_vm0, %v484_v21 }
 0x16a   : > { %2336 = vmatprep.mubr.msk.f32.mxu0 %vm450_vm0, %v485_v22 }
 0x16d   : > { %2337 = vmatmul.mubr.msk.f32.gmra.mrb[6].mxu0 %vm450_vm0, %v486_v23 }
 0x16e   : > { %2339 = vmatprep.mubr.msk.f32.mxu0 %vm450_vm0, %v487_v24 }
 0x171   : > { %2340 = vmatmul.mubr.msk.f32.gmra.mrb[8].mxu0 %vm450_vm0, %v488_v25 }
 0x172   : > { %2382 = vmatprep.mubr.msk.f32.mxu0 %vm2623_vm2, %v2622_v33 }
 0x234   : > { %v2329_v26 = vpop.f32.mrb[0].mxu0  ;;  %v2344_v51 = vpop.f32.mrb[0].mxu1 }
 0x235   : > { %v596_v27 = vpop.f32.mrb[1].mxu0  ;;  %v646_v52 = vpop.f32.mrb[1].mxu1 }
 0x236   : > { %655 = vxpose.xlu1.b32.start.end [1/1] (short) (narrow) %v596_v27, 8 }
 0x238   : > { %v2332_v30 = vpop.f32.mrb[2].mxu0 }
 0x239   : > { %v606_v31 = vpop.f32.mrb[3].mxu0 }
 0x23a   : > { %723 = vxpose.xlu1.b32.start.end [1/1] (short) (narrow) %v2329_v26, 8  ;;  %793 = vxpose.xlu0.b32.start.end [1/1] (short) (narrow) %v606_v31, 8 }
 0x23c   : > { %v2335_v32 = vpop.f32.mrb[4].mxu0 }
 0x23d   : > { %758 = vst.msk [vmem:[#allocation3 + $0x8] sm:$0xff] %vm687_vm1, %v2335_v32  ;;  %v616_v34 = vpop.f32.mrb[5].mxu0 }
 0x23e   : > { %863 = vxpose.xlu1.b32.start.end [1/1] (short) (narrow) %v2332_v30, 8  ;;  %689 = vst.msk [vmem:[#allocation3] sm:$0xff] %vm687_vm1, %v616_v34 }
 0x240   : > { %v2338_v35 = vpop.f32.mrb[6].mxu0 }
 0x241   : > { %898 = vst.msk [vmem:[#allocation3 + $0x18] sm:$0xff] %vm687_vm1, %v2338_v35  ;;  %v626_v36 = vpop.f32.mrb[7].mxu0 }
 0x242   : > { %828 = vst.msk [vmem:[#allocation3 + $0x10] sm:$0xff] %vm687_vm1, %v626_v36 }
 0x244   : > { %v2341_v38 = vpop.f32.mrb[8].mxu0  ;;  %v938_v45 = vld [vmem:[#allocation3 + $0x8] sm:$0xff] }
 0x245   : > { %v937_v37 = vld [vmem:[#allocation3] sm:$0xff]  ;;  %v636_v39 = vpop.f32.mrb[9].mxu0 }
 0x246   : > { %2346 = vmatpush3.msra.mxu1 %v937_v37  ;;  %690 = vxpose.xlu1.b32.start.end [1/1] (short) (narrow) %v636_v39, 8 }
 0x247   : > { %2350 = vmatprep.subr.mxu1 %v2622_v33 }
 0x248   : > { %v940_v49 = vld [vmem:[#allocation3 + $0x18] sm:$0xff] }
 0x249   : > { %v939_v46 = vld [vmem:[#allocation3 + $0x10] sm:$0xff] }
 0x2b6   : > { %v671_v40 = vpop.trf.xlu1 }
 0x2b7   : > { %688 = vst.msk [vmem:[#allocation2] sm:$0xff] %vm687_vm1, %v671_v40 }
 0x2ba   : > { %v739_v41 = vpop.trf.xlu1  ;;  %v809_v42 = vpop.trf.xlu0 }
 0x2bb   : > { %756 = vst.msk [vmem:[#allocation2 + $0x8] sm:$0xff] %vm687_vm1, %v739_v41  ;;  %826 = vst.msk [vmem:[#allocation2 + $0x10] sm:$0xff] %vm687_vm1, %v809_v42 }
 0x2be   : > { %v933_v43 = vld [vmem:[#allocation2] sm:$0xff]  ;;  %v879_v44 = vpop.trf.xlu1 }
 0x2bf   : > { %2348 = vmatmul.mubr.msk.f32.vlgmr.msra.gmra.mrb[2].mxu1 %vm687_vm1, %v933_v43  ;;  %896 = vst.msk [vmem:[#allocation2 + $0x18] sm:$0xff] %vm687_vm1, %v879_v44  ;;  %v1577_v43 = vld [vmem:[%s3087_s4] sm:$0xff]  ;;  %v1578_v44 = vld [vmem:[%s3087_s4 + $0x8] sm:$0xff] }
 0x2c0   : > { %2351 = vmatpush3.msra.mxu1 %v938_v45  ;;  %2352 = vmatprep.mubr.msk.f32.mxu1 %vm2623_vm2, %v2622_v33  ;;  %v1579_v45 = vld [vmem:[%s3087_s4 + $0x10] sm:$0xff] }
 0x2c1   : > { %2355 = vmatprep.subr.mxu1 %v2622_v33 }
 0x2c2   : > { %v934_v47 = vld [vmem:[#allocation2 + $0x8] sm:$0xff]  ;;  %v935_v48 = vld [vmem:[#allocation2 + $0x10] sm:$0xff] }
 0x2c3   : > { %2353 = vmatmul.mubr.msk.f32.vlgmr.msra.gmra.mrb[4].mxu1 %vm687_vm1, %v934_v47 }
 0x2c4   : > { %2356 = vmatpush3.msra.mxu1 %v939_v46  ;;  %2357 = vmatprep.mubr.msk.f32.mxu1 %vm2623_vm2, %v2622_v33 }
 0x2c5   : > { %2360 = vmatprep.subr.mxu1 %v2622_v33 }
 0x2c6   : > { %v936_v50 = vld [vmem:[#allocation2 + $0x18] sm:$0xff]  ;;  %v706_v53 = vpop.trf.xlu1 }
 0x2c7   : > { %2358 = vmatmul.mubr.msk.f32.vlgmr.msra.gmra.mrb[6].mxu1 %vm687_vm1, %v935_v48  ;;  %722 = vst.msk [vmem:[#allocation4] sm:$0xff] %vm687_vm1, %v706_v53  ;;  %v1580_v48 = vld [vmem:[%s3087_s4 + $0x18] sm:$0xff] }
 0x2c8   : > { %2361 = vmatpush3.msra.mxu1 %v940_v49  ;;  %2362 = vmatprep.mubr.msk.f32.mxu1 %vm2623_vm2, %v2622_v33 }
 0x2c9   : > { %2365 = vmatprep.subr.mxu1 %v2622_v33 }
 0x2cb   : > { %2363 = vmatmul.mubr.msk.f32.vlgmr.msra.gmra.mrb[8].mxu1 %vm687_vm1, %v936_v50 }
 0x2cc   : > { %2367 = vmatprep.mubr.msk.f32.mxu1 %vm2623_vm2, %v2622_v33 }
 0x2ce   : > { %v941_v3 = vld [vmem:[#allocation4] sm:$0xff] }
 0x2cf   : > { %2366 = vmatpush3.msra.mxu1 %v941_v3 }
 0x2d0   : > { %2370 = vmatprep.subr.mxu1 %v2622_v33 }
 0x392   : > { %v1014_v54 = vpop.f32.mrb[2].mxu1 }
 0x393   : > { %v2349_v55 = vpop.f32.mrb[3].mxu1  ;;  %v1237_v56 = vsel %vm687_vm1, %v1014_v54, -inf }
 0x394   : > { %1238 = vmax.xlane.f32.xlu1 %v1237_v56 }
 0x396   : > { %v1087_v57 = vpop.f32.mrb[4].mxu1 }
 0x397   : > { %v2354_v58 = vpop.f32.mrb[5].mxu1  ;;  %v1240_v59 = vsel %vm687_vm1, %v1087_v57, -inf }
 0x398   : > { %1241 = vmax.xlane.f32.xlu1 %v1240_v59 }
 0x39a   : > { %v1160_v60 = vpop.f32.mrb[6].mxu1 }
 0x39b   : > { %v2359_v61 = vpop.f32.mrb[7].mxu1  ;;  %v1243_v62 = vsel %vm687_vm1, %v1160_v60, -inf }
 0x39c   : > { %1244 = vmax.xlane.f32.xlu0 %v1243_v62 }
 0x39e   : > { %v1233_v63 = vpop.f32.mrb[8].mxu1 }
 0x39f   : > { %v2364_v1 = vpop.f32.mrb[9].mxu1  ;;  %v1246_v2 = vsel %vm687_vm1, %v1233_v63, -inf }
 0x3a0   : > { %1247 = vmax.xlane.f32.xlu1 %v1246_v2 }
 0x3c9   : > { %759 = vxpose.xlu0.b32.start.end [1/1] (short) (narrow) %v2341_v38, 8 }
 0x3d3   : > { %829 = vxpose.xlu1.b32.start.end [1/1] (short) (narrow) %v646_v52, 8 }
 0x421   : > { %v1239_v4 = vpop.xlane.xlu1 %1238 }
 0x422   : > { %v1249_v5 = vsub.f32 %v1014_v54, %v1239_v4 }
 0x424   : > { %v1253_v6 = vmul.f32 1.442695, %v1249_v5 }
 0x425   : > { %v1242_v7 = vpop.xlane.xlu1 %1241 }
 0x426   : > { %2506 = vpow2.f32 %v1253_v6  ;;  %v1250_v8 = vsub.f32 %v1087_v57, %v1242_v7 }
 0x428   : > { %v1255_v9 = vmul.f32 1.442695, %v1250_v8 }
 0x429   : > { %v1245_v10 = vpop.xlane.xlu0 %1244 }
 0x42a   : > { %2508 = vpow2.f32 %v1255_v9  ;;  %v1251_v11 = vsub.f32 %v1160_v60, %v1245_v10 }
 0x42c   : > { %v1257_v12 = vmul.f32 1.442695, %v1251_v11 }
 0x42d   : > { %v1248_v13 = vpop.xlane.xlu1 %1247 }
 0x42e   : > { %2510 = vpow2.f32 %v1257_v12  ;;  %v1252_v14 = vsub.f32 %v1233_v63, %v1248_v13 }
 0x430   : > { %v2507_v15 = vpop.eup %2506  ;;  %v1259_v16 = vmul.f32 1.442695, %v1252_v14 }
 0x431   : > { %v1261_v17 = vsel %vm687_vm1, %v2507_v15, 0.0 }
 0x432   : > { %2512 = vpow2.f32 %v1259_v16  ;;  %1262 = vadd.xlane.f32.xlu1 %v1261_v17  ;;  %v2624_v17 = vmov 0.0|0.0  }
 0x434   : > { %v2509_v18 = vpop.eup %2508 }
 0x435   : > { %v1264_v19 = vsel %vm687_vm1, %v2509_v18, 0.0 }
 0x436   : > { %1265 = vadd.xlane.f32.xlu1 %v1264_v19  ;;  %v1921_v19 = vld [vmem:[%s3068_s8 + $0x18] sm:$0xff] }
 0x438   : > { %v2511_v20 = vpop.eup %2510 }
 0x439   : > { %v1267_v21 = vsel %vm687_vm1, %v2511_v20, 0.0 }
 0x43a   : > { %1268 = vadd.xlane.f32.xlu1 %v1267_v21 }
 0x43c   : > { %v2513_v22 = vpop.eup %2512 }
 0x43d   : > { %v1270_v23 = vsel %vm687_vm1, %v2513_v22, 0.0 }
 0x43e   : > { %1271 = vadd.xlane.f32.xlu1 %v1270_v23 }
 0x449   : > { %v775_v24 = vpop.trf.xlu0 }
 0x44a   : > { %792 = vst.msk [vmem:[#allocation4 + $0x8] sm:$0xff] %vm687_vm1, %v775_v24 }
 0x451   : > { %v942_v32 = vld [vmem:[#allocation4 + $0x8] sm:$0xff] }
 0x453   : > { %v845_v25 = vpop.trf.xlu1 }
 0x454   : > { %862 = vst.msk [vmem:[#allocation4 + $0x10] sm:$0xff] %vm687_vm1, %v845_v25  ;;  %v2260_v25 = vld [vmem:[%s3089_s6] ss:$0 sm:$0xff] }
 0x45b   : > { %v943_v36 = vld [vmem:[#allocation4 + $0x10] sm:$0xff] }
 0x471   : > { %899 = vxpose.xlu1.b32.start.end [1/1] (short) (narrow) %v2344_v51, 8 }
 0x4bf   : > { %v1263_v26 = vpop.xlane.xlu1 %1262 }
 0x4c0   : > { %2514 = vrcp.f32 %v1263_v26 }
 0x4c3   : > { %v1266_v27 = vpop.xlane.xlu1 %1265 }
 0x4c4   : > { %2516 = vrcp.f32 %v1266_v27  ;;  %v2261_v27 = vld [vmem:[%s3067_s7] ss:$0 sm:$0xff] }
 0x4c7   : > { %v1269_v28 = vpop.xlane.xlu1 %1268 }
 0x4c8   : > { %2518 = vrcp.f32 %v1269_v28 }
 0x4ca   : > { %v2515_v29 = vpop.eup %2514 }
 0x4cb   : > { %v1277_v30 = vmul.f32 %v2515_v29, %v2507_v15  ;;  %v1272_v31 = vpop.xlane.xlu1 %1271  ;;  %v1918_v15 = vld [vmem:[%s3068_s8] sm:$0xff] }
 0x4cc   : > { %2520 = vrcp.f32 %v1272_v31  ;;  %v2008_v31 = vld [vmem:[%s3070_s10 + $0x8] sm:$0xff] }
 0x4cd   : > { %2368 = vmatmul.mubr.msk.f32.vlgmr.msra.gmra.mrb[10].mxu1 %vm687_vm1, %v1277_v30  ;;  %1281 = vst.msk [vmem:[%s2863_s23] sm:$0xff] %vm687_vm1, %v1277_v30  ;;  %v2007_v30 = vld [vmem:[%s3070_s10] sm:$0xff] }
 0x4ce   : > { %v2517_v34 = vpop.eup %2516  ;;  %2371 = vmatpush3.msra.mxu1 %v942_v32  ;;  %2372 = vmatprep.mubr.msk.f32.mxu1 %vm2623_vm2, %v2622_v33  ;;  %v2442_v32 = vpack.c.bf16 %v2008_v31, %v2007_v30 }
 0x4cf   : > { %v1278_v35 = vmul.f32 %v2517_v34, %v2509_v18  ;;  %2375 = vmatprep.subr.mxu1 %v2622_v33  ;;  %v1920_v18 = vld [vmem:[%s3068_s8 + $0x10] sm:$0xff] }
 0x4d0   : > { %v2009_v34 = vld [vmem:[%s3070_s10 + $0x10] sm:$0xff] }
 0x4d1   : > { %2373 = vmatmul.mubr.msk.f32.vlgmr.msra.gmra.mrb[12].mxu1 %vm687_vm1, %v1278_v35  ;;  %1282 = vst.msk [vmem:[%s2863_s23 + $0x8] sm:$0xff] %vm687_vm1, %v1278_v35  ;;  %v2010_v35 = vld [vmem:[%s3070_s10 + $0x18] sm:$0xff] }
 0x4d2   : > { %v2519_v37 = vpop.eup %2518  ;;  %2376 = vmatpush3.msra.mxu1 %v943_v36  ;;  %2377 = vmatprep.mubr.msk.f32.mxu1 %vm2623_vm2, %v2622_v33  ;;  %v2445_v36 = vpack.c.bf16 %v2010_v35, %v2009_v34 }
 0x4d3   : > { %v1279_v38 = vmul.f32 %v2519_v37, %v2511_v20  ;;  %2385 = vmatprep.subr.mxu1 %v2622_v33  ;;  %v2439_v20 = vpack.c.bf16 %v1921_v19, %v1920_v18  ;;  %v2011_v37 = vld [vmem:[%s3070_s10 + $0x20] sm:$0xff] }
 0x4d5   : > { %2378 = vmatmul.mubr.msk.f32.vlgmr.msra.gmra.mrb[14].mxu1 %vm687_vm1, %v1279_v38  ;;  %1283 = vst.msk [vmem:[%s2863_s23 + $0x10] sm:$0xff] %vm687_vm1, %v1279_v38  ;;  %v2012_v38 = vld [vmem:[%s3070_s10 + $0x28] sm:$0xff] }
 0x4d6   : > { %v2521_v39 = vpop.eup %2520  ;;  %2387 = vmatprep.mubr.msk.f32.mxu1 %vm2623_vm2, %v2622_v33  ;;  %2386 = vmatpush3.msra.mxu1 %v1577_v43  ;;  %v2262_v43 = vld [vmem:[%s3069_s9] ss:$0 sm:$0xff] }
 0x4d7   : > { %v1280_v40 = vmul.f32 %v2521_v39, %v2513_v22  ;;  %2395 = vmatprep.subr.mxu1 %v2622_v33  ;;  %v2448_v39 = vpack.c.bf16 %v2012_v38, %v2011_v37 }
 0x4d9   : > { %1284 = vst.msk [vmem:[%s2863_s23 + $0x18] sm:$0xff] %vm687_vm1, %v1280_v40  ;;  %s2532_s23 = scalar_lea.vmem %s2531_s2, 1024 }
 0x4da   : > { %p2534_p1 = scmp.lt.s32.totalorder %s2532_s23, %s2526_s0 }
 0x4dc   : > { %p2535_p2 = por %p2534_p1, %p2533_p0 }
 0x4de   : > { %p2536_p3 = pnand %p2535_p2, %p2529_p13 }
 0x4f1   : > { %v915_v41 = vpop.trf.xlu1 }
 0x4f2   : > { %932 = vst.msk [vmem:[#allocation4 + $0x18] sm:$0xff] %vm687_vm1, %v915_v41  ;;  %v2014_v41 = vld [vmem:[%s3070_s10 + $0x38] sm:$0xff] }
 0x4f9   : > { %v944_v42 = vld [vmem:[#allocation4 + $0x18] sm:$0xff] }
 0x4fa   : > { %2381 = vmatpush3.msra.mxu0 %v944_v42 }
 0x4fb   : > { %2383 = vmatmul.mubr.msk.f32.vlgmr.msra.gmra.mrb[10].mxu0 %vm687_vm1, %v1280_v40  ;;  %2390 = vmatprep.subr.mxu0 %v2622_v33  ;;  %v2013_v40 = vld [vmem:[%s3070_s10 + $0x30] sm:$0xff] }
 0x4fc   : > { %2392 = vmatprep.mubr.msk.f32.mxu0 %vm2623_vm2, %v2622_v33  ;;  %2391 = vmatpush3.msra.mxu0 %v1578_v44  ;;  %v2451_v42 = vpack.c.bf16 %v2014_v41, %v2013_v40 }
 0x4fd   : > { %2400 = vmatprep.subr.mxu0 %v2622_v33 }
 0x5a0   : > { %v1354_v46 = vpop.f32.mrb[10].mxu1 }
 0x5a1   : > { %v2369_v47 = vpop.f32.mrb[11].mxu1  ;;  %2388 = vmatmul.mubr.msk.f32.vlgmr.msra.gmra.mrb[16].mxu1 %vm687_vm1, %v1354_v46 }
 0x5a2   : > { %2396 = vmatpush3.msra.mxu1 %v1579_v45  ;;  %2397 = vmatprep.mubr.msk.f32.mxu1 %vm2623_vm2, %v2622_v33 }
 0x5a3   : > { %2435 = vmatprep.subr.bf16.mxu1 %v2624_v17 }
 0x5a4   : > { %v1427_v49 = vpop.f32.mrb[12].mxu1 }
 0x5a5   : > { %v2374_v50 = vpop.f32.mrb[13].mxu1  ;;  %2393 = vmatmul.mubr.msk.f32.vlgmr.msra.gmra.mrb[12].mxu0 %vm687_vm1, %v1427_v49 }
 0x5a6   : > { %2401 = vmatpush3.msra.mxu0 %v1580_v48  ;;  %2402 = vmatprep.mubr.msk.f32.mxu0 %vm2623_vm2, %v2622_v33 }
 0x5a7   : > { %2441 = vmatprep.subr.bf16.mxu0 %v2624_v17 }
 0x5a8   : > { %v1500_v51 = vpop.f32.mrb[14].mxu1 }
 0x5a9   : > { %v2379_v52 = vpop.f32.mrb[15].mxu1  ;;  %2398 = vmatmul.mubr.msk.f32.vlgmr.msra.gmra.mrb[18].mxu1 %vm687_vm1, %v1500_v51 }
 0x5aa   : > { %2413 = vmatprep.mubr.msk.f32.mxu1 %vm2623_vm2, %v2622_v33 }
 0x5ce   : > { %v1573_v53 = vpop.f32.mrb[10].mxu0 }
 0x5cf   : > { %v2384_v54 = vpop.f32.mrb[11].mxu0  ;;  %2403 = vmatmul.mubr.msk.f32.vlgmr.msra.gmra.mrb[14].mxu0 %vm687_vm1, %v1573_v53 }
 0x5d0   : > { %2432 = vmatprep.mubr.msk.f32.mxu0 %vm2623_vm2, %v2622_v33  ;;  %v2259_v33 = vld [vmem:[%s3088_s5] ss:$0 sm:$0xff]  ;;  %2443 = vmatpush3.bf16.msra.mxu0 %v2442_v32 }
 0x5d1   : > { %2444 = vmatprep.subr.bf16.mxu0 %v2624_v17 }
 0x5d4   : > { %2446 = vmatpush3.bf16.msra.mxu0 %v2445_v36 }
 0x5d5   : > { %2447 = vmatprep.subr.bf16.mxu0 %v2624_v17 }
 0x5d8   : > { %2449 = vmatpush3.bf16.msra.mxu0 %v2448_v39 }
 0x5d9   : > { %2450 = vmatprep.subr.bf16.mxu0 %v2624_v17 }
 0x5dc   : > { %2452 = vmatpush3.bf16.msra.mxu0 %v2451_v42 }
 0x674   : > { %v1650_v55 = vpop.f32.mrb[16].mxu1 }
 0x675   : > { %v2389_v56 = vpop.f32.mrb[17].mxu1  ;;  %v1873_v58 = vsel %vm450_vm0, %v1650_v55, 0.0 }
 0x678   : > { %v1723_v57 = vpop.f32.mrb[12].mxu0 }
 0x679   : > { %v1874_v59 = vsel %vm450_vm0, %v1723_v57, 0.0  ;;  %v2394_v60 = vpop.f32.mrb[13].mxu0 }
 0x67a   : > { %v1875_v61 = vadd.f32 %v1874_v59, %v1873_v58 }
 0x67c   : > { %v1796_v62 = vpop.f32.mrb[18].mxu1 }
 0x67d   : > { %v1876_v63 = vsel %vm450_vm0, %v1796_v62, 0.0  ;;  %v2399_v1 = vpop.f32.mrb[19].mxu1 }
 0x67e   : > { %v1877_v2 = vadd.f32 %v1876_v63, %v1875_v61 }
 0x6a2   : > { %v1869_v3 = vpop.f32.mrb[14].mxu0 }
 0x6a3   : > { %v1878_v4 = vsel %vm450_vm0, %v1869_v3, 0.0  ;;  %v2404_v5 = vpop.f32.mrb[15].mxu0 }
 0x6a4   : > { %v1879_v6 = vadd.f32 %v1878_v4, %v1877_v2 }
 0x6a6   : > { %v1880_v7 = vadd.f32 %v1879_v6, %v2752_v0  ;;  %v1919_v0 = vld [vmem:[%s3068_s8 + $0x8] sm:$0xff] }
 0x6a7   : > { %v2436_v16 = vpack.c.bf16 %v1919_v0, %v1918_v15 }
 0x6a8   : > { %v2922_v8 = vadd.f32 %v2259_v33, %v1880_v7 }
 0x6a9   : > { %2437 = vmatpush3.bf16.msra.mxu1 %v2436_v16 }
 0x6aa   : > { %v1891_v9 = vsel %vm450_vm0, %v2922_v8, 0.0  ;;  %2438 = vmatprep.subr.bf16.mxu1 %v2624_v17 }
 0x6ab   : > { %1892 = vadd.xlane.f32.xlu1 %v1891_v9 }
 0x6ad   : > { %2440 = vmatpush3.bf16.msra.mxu1 %v2439_v20 }
 0x738   : > { %v1893_v10 = vpop.xlane.xlu1 %1892 }
 0x739   : > { %v1894_v11 = vmul.f32 0.03125, %v1893_v10 }
 0x73b   : > { %v1895_v12 = vsub.f32 %v2922_v8, %v1894_v11 }
 0x73d   : > { %v1896_v13 = vmul.f32 %v1895_v12, %v1895_v12 }
 0x73f   : > { %v1897_v14 = vsel %vm450_vm0, %v1896_v13, 0.0 }
 0x740   : > { %1898 = vadd.xlane.f32.xlu0 %v1897_v14 }
 0x7cd   : > { %v1899_v21 = vpop.xlane.xlu0 %1898 }
 0x7ce   : > { %v1900_v22 = vmul.f32 0.03125, %v1899_v21 }
 0x7d0   : > { %v1901_v23 = vadd.f32 1e-05, %v1900_v22 }
 0x7d2   : > { %2522 = vrsqrt.f32 %v1901_v23 }
 0x7dc   : > { %v2523_v24 = vpop.eup %2522 }
 0x7dd   : > { %v1903_v26 = vmul.f32 %v2523_v24, %v1895_v12 }
 0x7df   : > { %v1910_v28 = vmul.f32 %v2260_v25, %v1903_v26 }
 0x7e1   : > { %v1917_v29 = vadd.f32 %v2261_v27, %v1910_v28 }
 0x7e3   : > { %2414 = vmatmul.mubr.msk.f32.vlgmr.msra.gmra.mrb[20].mxu1 %vm450_vm0, %v1917_v29 }
 0x8b6   : > { %v1998_v44 = vpop.f32.mrb[20].mxu1 }
 0x8b7   : > { %v1999_v45 = vadd.f32 %v2262_v43, %v1998_v44  ;;  %v2415_v46 = vpop.f32.mrb[21].mxu1 }
 0x8b9   : > { %v2003_v47 = vmul.f32 0.70710677, %v1999_v45  ;;  %v2002_v49 = vmul.f32 0.5, %v1999_v45 }
 0x8bb   : > { %2524 = verf.f32 %v2003_v47 }
 0x8c5   : > { %v2525_v48 = vpop.eup %2524 }
 0x8c6   : > { %v2005_v50 = vadd.f32 1.0, %v2525_v48 }
 0x8c8   : > { %v2006_v51 = vmul.f32 %v2005_v50, %v2002_v49 }
 0x8ca   : > { %2433 = vmatmul.mubr.msk.f32.vlgmr.msra.gmra.mrb[16].mxu0 %vm2015_vm3, %v2006_v51 }
 0x8cb   : > { %2539 = shalt.err (!%p2536_p3)
}
 0x8cc   : > { %s2540_s16 = scalar_lea.hbm %s2981_s24, 512  ;;  %s2544_s1 = scalar_lea.hbm %s3073_s13, 1024 }
 0x8cd   : > { %p2541_p4 = scmp.ne.s32.totalorder %s2981_s24, %s2540_s16  ;;  %p2545_p9 = scmp.lt.u32.totalorder %s2981_s24, %s3073_s13 }
 0x8ce   : > { %p2546_p10 = scmp.lt.u32.totalorder %s2544_s1, %s2540_s16  ;;  %p2548_p12 = scmp.lt.u32.totalorder %s2540_s16, %s2981_s24 }
 0x8cf   : > { %p2542_p7 = pnand %p2541_p4, %p2737_p5 }
 0x8d0   : > { %p2547_p11 = por %p2546_p10, %p2545_p9 }
 0x8d1   : > { %p2543_p8 = pneg %p2542_p7 }
 0x8d2   : > { %p2549_p13 = por %p2548_p12, %p2547_p11 }
 0x8d4   : > { %p2550_p0 = pnand %p2549_p13, %p2543_p8 }
 0x8d6   : > { %2553 = shalt.err (!%p2550_p0)
}
 0x8d7   : > { %s2626_s0 = smov 128   ;;  %s2627_s23 = smov 8   ;;  %v2265_v53 = vld [vmem:[%s3071_s11] ss:$0 sm:$0xff] }
 0x8d8   : > { %s3090_s20 = scalar_lea.sflag [#allocation8], %s2859_s21  ;;  %s2229_s30 = sshll.u32 %s2859_s21, 3 }
 0x8d9   : > { %2456 = dma.vmem_to_hbm [thread:$0]  (%p2737_p5), %s2976_s15, 512, %s2981_s24, %s3090_s20, %s2626_s0, %s2626_s0, %s2627_s23  }
 0x8da   : > { %s2268_s1 = sshll.u32 %s2720_s29, 7  ;;  %s435_s2 = scalar_lea.vmem [#allocation5], %s2229_s30 }
 0x8db   : > { %s2118_s3 = sshll.u32 %s435_s2, 4  ;;  %s3016_s6 = scalar_lea.hbm %s3072_s12, %s2268_s1  ;;  %s3018_s3 = int_to_ptr.vmem [resolvable:$true] %s2118_s3 }
 0x8dc   : > { %s2100_s15 = scalar_lea.sflag [#allocation6], %s2859_s21  ;;  %s2554_s29 = scalar_lea.vmem %s3018_s3, 128 }
 0x8dd   : > { %p2555_p1 = scmp.ne.s32.totalorder %s3018_s3, %s2554_s29  ;;  %s2628_s24 = smov [#allocation5]  }
 0x8de   : > { %s2558_s0 = sshll.u32 %s2628_s24, 4  ;;  %s2559_s0 = int_to_ptr.vmem [resolvable:$false] %s2558_s0 }
 0x8df   : > { %p2556_p2 = pnand %p2555_p1, %p2737_p5  ;;  %s2560_s23 = scalar_lea.vmem %s2559_s0, 256 }
 0x8e0   : > { %p2561_p4 = scmp.lt.s32.totalorder %s3018_s3, %s2559_s0  ;;  %p2562_p7 = scmp.lt.s32.totalorder %s2560_s23, %s2554_s29 }
 0x8e1   : > { %p2557_p3 = pneg %p2556_p2 }
 0x8e2   : > { %p2563_p8 = por %p2562_p7, %p2561_p4 }
 0x8e4   : > { %p2564_p9 = pnand %p2563_p8, %p2557_p3 }
 0x99d   : > { %v2085_v52 = vpop.f32.mrb[16].mxu0 }
 0x99e   : > { %v2089_v54 = vadd.f32 %v2085_v52, %v2922_v8  ;;  %v2434_v55 = vpop.f32.mrb[17].mxu0 }
 0x9a0   : > { %v2097_v56 = vadd.f32 %v2265_v53, %v2089_v54 }
 0x9a2   : > { %2098 = vst.msk [vmem:[%s435_s2] sm:$0xff] %vm450_vm0, %v2097_v56 }
 0x9a3   : > { %2567 = shalt.err (!%p2564_p9)
}
 0x9a4   : > { %s2568_s4 = scalar_lea.hbm %s3016_s6, 128  ;;  %s2572_s20 = scalar_lea.hbm %s3072_s12, 256 }
 0x9a5   : > { %p2569_p10 = scmp.ne.s32.totalorder %s3016_s6, %s2568_s4  ;;  %p2573_p13 = scmp.lt.u32.totalorder %s3016_s6, %s3072_s12 }
 0x9a6   : > { %p2574_p0 = scmp.lt.u32.totalorder %s2572_s20, %s2568_s4  ;;  %p2576_p2 = scmp.lt.u32.totalorder %s2568_s4, %s3016_s6 }
 0x9a7   : > { %p2570_p11 = pnand %p2569_p10, %p2737_p5 }
 0x9a8   : > { %p2575_p1 = por %p2574_p0, %p2573_p13 }
 0x9a9   : > { %p2571_p12 = pneg %p2570_p11 }
 0x9aa   : > { %p2577_p3 = por %p2576_p2, %p2575_p1 }
 0x9ac   : > { %p2578_p4 = pnand %p2577_p3, %p2571_p12 }
 0x9ae   : > { %2581 = shalt.err (!%p2578_p4)
}
 0x9af   : > { %2455 = dma.vmem_to_hbm [thread:$0]  (%p2737_p5), %s3018_s3, 128, %s3016_s6, %s2100_s15  }
 0x9b0 PF: > { %p2466_p7 = scmp.ge.s32.totalorder %s2620_s28, 2  ;;  %s2146_s16 = sand.u32 1, %s2608_s25  }
 0x9b1   : > { %s2147_s1 = scalar_lea.sflag [#allocation6], %s2146_s16 }
 0x9b2   : > { %p2460_p8 = pnand %p2466_p7, %p2741_p6 }
 0x9b4   : > { %2599 = dma.done.wait (!%p2460_p8), %s2147_s1, 128  }
 0x9b5   : > { %2601 = vsyncadd (!%p2460_p8), %s2147_s1, 4294967168  ;;  %s2156_s2 = scalar_lea.sflag [#allocation8], %s2146_s16 }
 0x9b6   : > { %2603 = dma.done.wait (!%p2460_p8), %s2156_s2, 512  }
 0x9b7   : > { %2605 = vsyncadd (!%p2460_p8), %s2156_s2, 4294966784  ;;  %p27_p5 = scmp.ge.s32.totalorder %s2724_s14, 4   ;;  %s3091_s25 = smov %s2612_s26 }
 0x9b8   : > { %s3092_s26 = smov %s2616_s27  ;;  %s3093_s27 = smov %s2735_s17 }
 0x9b9   : > { %s3094_s28 = smov %s2724_s14  ;;  %29 = sbr.rel (!%p27_p5) target bundleno = 13 (0xd), region = 129 }
 0x9c0   :  { %2161 = vsyncpa [#allocation6], 1 }
 0x9c1   :  { %2163 = vsyncpa [#allocation6 + $0x1], 1 }
 0x9c2   :  { %2164 = vsyncpa [#allocation8], 1 }
 0x9c3   :  { %2166 = vsyncpa [#allocation8 + $0x1], 1 }

</bundles_post_ra>
